<compile_context>
chip_gen: v5e
topology: v5e:2x2
jax: 0.10.0
libtpu: 0.0.40
codegen_flags: <defaults>
</compile_context>

<pallas_src>
import functools

import jax
import jax.numpy as jnp
from jax import lax
from jax.experimental import pallas as pl
from jax.experimental.pallas import tpu as pltpu

# Below this many bytes per channel, skip the kernel (launch cost dominates).
_SMALL_CHANNEL_BYTES = 1 << 20  # 1 MiB


def _pick_chunks(H, W, itemsize):
    """Static (start_row, n_rows) chunks along H for concurrent DMAs."""
    bytes_per_channel = H * W * itemsize
    if bytes_per_channel <= (1 << 20):
        n_target = 1          # single DMA: already latency/issue bound
    elif bytes_per_channel <= (4 << 20):
        n_target = 4
    else:
        n_target = 8          # sized for v7x-class HBM bandwidth
    rows = -(-H // n_target)                     # ceil(H / n_target)
    rows = max(8, ((rows + 7) // 8) * 8)          # multiple of 8 sublanes
    chunks = []
    r = 0
    while r < H:
        chunks.append((r, min(rows, H - r)))
        r += rows
    return tuple(chunks)


def _make_get_channel_kernel(chunks):
    """Kernel issuing one HBM->HBM DMA per static H-chunk, all in flight."""

    def kernel(ch_ref, x_hbm, o_hbm, sem):
        ch = ch_ref[0]
        copies = []
        # Start every DMA before waiting on any -> N concurrent descriptors.
        for i, (r0, rows) in enumerate(chunks):
            cp = pltpu.make_async_copy(
                x_hbm.at[pl.ds(ch, 1), pl.ds(r0, rows)],
                o_hbm.at[:, pl.ds(r0, rows)],
                sem.at[i],
            )
            cp.start()
            copies.append(cp)
        for cp in copies:
            cp.wait()

    return kernel


@functools.partial(jax.jit, static_argnames=("force_pallas",))
def _get_channel_impl(x, ch, *, force_pallas):
    C, H, W = x.shape

    # PyTorch-style negative indexing + clamp (no OOB DMA for traced values).
    ch = jnp.where(ch < 0, ch + C, ch)
    ch = jnp.clip(ch, 0, C - 1).astype(jnp.int32)

    bytes_per_channel = H * W * x.dtype.itemsize
    if bytes_per_channel < _SMALL_CHANNEL_BYTES and not force_pallas:
        # Fast path: fused slice, effectively free under XLA.
        return lax.dynamic_slice(x, (ch, jnp.int32(0), jnp.int32(0)), (1, H, W))

    chunks = _pick_chunks(H, W, x.dtype.itemsize)
    kernel = _make_get_channel_kernel(chunks)

    return pl.pallas_call(
        kernel,
        out_shape=jax.ShapeDtypeStruct((1, H, W), x.dtype),
        grid_spec=pltpu.PrefetchScalarGridSpec(
            num_scalar_prefetch=1,           # channel index -> SMEM
            grid=(1,),
            # Leave operands in place (HBM); kernel DMAs directly.
            in_specs=[pl.BlockSpec(memory_space=pl.ANY)],
            out_specs=pl.BlockSpec(memory_space=pl.ANY),
            scratch_shapes=[pltpu.SemaphoreType.DMA((len(chunks),))],
        ),
        compiler_params=pltpu.CompilerParams(
            dimension_semantics=("arbitrary",),
        ),
    )(ch.reshape((1,)), x)


def get_channel(x: jax.Array, channel, *, force_pallas: bool = False) -> jax.Array:
    """Pallas equivalent of GetChannel(channel).forward(x).

    x: (C, H, W)  ->  (1, H, W) == x[channel][None]   (CHW, like PyTorch)

    `channel` may be a Python int or a traced int32 scalar; negative indices
    wrap like PyTorch, and the index is clamped into [0, C-1] before the DMA.
    """
    C, H, W = x.shape
    if isinstance(channel, int):
        assert -C <= channel < C, "channel out of range"
    ch = jnp.asarray(channel, dtype=jnp.int32)
    return _get_channel_impl(x, ch, force_pallas=force_pallas)


if __name__ == "__main__":
    key = jax.random.PRNGKey(0)
    C, H, W = 4, 16, 16
    x = jax.random.normal(key, (C, H, W), dtype=jnp.float32)

    # Exercise the actual Pallas kernel path (force past the small-input
    # fast path so the DMA kernel is compiled and run on the TPU).
    channel = 2
    out = jax.block_until_ready(get_channel(x, channel, force_pallas=True))
    ref = x[channel][None]  # PyTorch: tensor[self.channel].unsqueeze(0)
    assert out.shape == (1, H, W), out.shape
    assert out.dtype == x.dtype
    assert jnp.array_equal(out, ref), "mismatch vs reference"

    # Negative index (PyTorch semantics), still through the Pallas kernel.
    out_neg = jax.block_until_ready(get_channel(x, -1, force_pallas=True))
    assert jnp.array_equal(out_neg, x[-1][None]), "mismatch vs reference (ch=-1)"

    # Traced runtime channel via the default wrapper (small-input fast path);
    # same compiled executable serves any channel value.
    out0 = jax.block_until_ready(get_channel(x, jnp.int32(0)))
    assert jnp.array_equal(out0, x[0][None]), "mismatch vs reference (ch=0)"

    print("KERNEL_OK")
</pallas_src>

<mosaic_0001>
module attributes {stable_mosaic.version = 11 : i64} {
  func.func @kernel(%arg0: i32, %arg1: memref<1xi32, #tpu.memory_space<smem>>, %arg2: memref<4x16x16xf32, #tpu.memory_space<any>>, %arg3: memref<1x16x16xf32, #tpu.memory_space<any>>, %arg4: memref<1x!tpu.dma_semaphore, #tpu.memory_space<semaphore_mem>>) attributes {dimension_semantics = [#tpu.dimension_semantics<arbitrary>], iteration_bounds = array<i64: 1>, scalar_prefetch = 1 : i64, scratch_operands = 1 : i64, tpu.core_type = #tpu.core_type<tc>, window_params = [{}, {}]} {
    %c0 = arith.constant 0 : index
    %0 = memref.load %arg1[%c0] : memref<1xi32, #tpu.memory_space<smem>>
    %c0_i32 = arith.constant 0 : i32
    %c0_i32_0 = arith.constant 0 : i32
    %c0_i32_1 = arith.constant 0 : i32
    %1 = tpu.memref_slice %arg2[%0, %c0_i32_0, %c0_i32_1] : memref<4x16x16xf32, #tpu.memory_space<any>> -> memref<1x16x16xf32, #tpu.memory_space<any>>
    %c0_i32_2 = arith.constant 0 : i32
    %c0_i32_3 = arith.constant 0 : i32
    %c0_i32_4 = arith.constant 0 : i32
    %2 = tpu.memref_slice %arg3[%c0_i32_2, %c0_i32_3, %c0_i32_4] : memref<1x16x16xf32, #tpu.memory_space<any>> -> memref<1x16x16xf32, #tpu.memory_space<any>>
    %3 = tpu.memref_slice %arg4[%c0_i32] : memref<1x!tpu.dma_semaphore, #tpu.memory_space<semaphore_mem>> -> memref<1x!tpu.dma_semaphore, #tpu.memory_space<semaphore_mem>>
    %4 = tpu.memref_squeeze %3 : memref<1x!tpu.dma_semaphore, #tpu.memory_space<semaphore_mem>> -> memref<!tpu.dma_semaphore, #tpu.memory_space<semaphore_mem>>
    tpu.enqueue_dma source(%1 : memref<1x16x16xf32, #tpu.memory_space<any>>) target(%2 : memref<1x16x16xf32, #tpu.memory_space<any>>) target_semaphore(%4 : memref<!tpu.dma_semaphore, #tpu.memory_space<semaphore_mem>>)
    %c0_i32_5 = arith.constant 0 : i32
    %c0_i32_6 = arith.constant 0 : i32
    %c0_i32_7 = arith.constant 0 : i32
    %5 = tpu.memref_slice %arg2[%0, %c0_i32_6, %c0_i32_7] : memref<4x16x16xf32, #tpu.memory_space<any>> -> memref<1x16x16xf32, #tpu.memory_space<any>>
    %c0_i32_8 = arith.constant 0 : i32
    %c0_i32_9 = arith.constant 0 : i32
    %c0_i32_10 = arith.constant 0 : i32
    %6 = tpu.memref_slice %arg3[%c0_i32_8, %c0_i32_9, %c0_i32_10] : memref<1x16x16xf32, #tpu.memory_space<any>> -> memref<1x16x16xf32, #tpu.memory_space<any>>
    %7 = tpu.memref_slice %arg4[%c0_i32_5] : memref<1x!tpu.dma_semaphore, #tpu.memory_space<semaphore_mem>> -> memref<1x!tpu.dma_semaphore, #tpu.memory_space<semaphore_mem>>
    %8 = tpu.memref_squeeze %7 : memref<1x!tpu.dma_semaphore, #tpu.memory_space<semaphore_mem>> -> memref<!tpu.dma_semaphore, #tpu.memory_space<semaphore_mem>>
    tpu.wait_dma2 semaphore(%8 : memref<!tpu.dma_semaphore, #tpu.memory_space<semaphore_mem>>) src(%5 : memref<1x16x16xf32, #tpu.memory_space<any>>) dst(%6 : memref<1x16x16xf32, #tpu.memory_space<any>>)
    return
  }
}

</mosaic_0001>

<bundles_post_ra>
// kernel: _get_channel_impl.1
= control target key start
LH: loop header
LB: loop body
LE: loop exit
PB: predicated region body
PF: predicated region fallthrough
CT: control target
= control target key end

     0   :  { %s41_s19 = smov [#allocation2]   ;;  %s42_s20 = smov [#allocation5]   ;;  %s68_s0 = inlined_call_operand.<no memory space> [shape: s32[1], index: 0, kind: input, shape index: {}]   ;;  %s69_s1 = inlined_call_operand.hbm [shape: f32[4,16,16], index: 1, kind: input, shape index: {}]   ;;  %s70_s2 = inlined_call_operand.hbm [shape: f32[1,16,16], index: 2, kind: output, shape index: {}]  }
   0x1   :  { %s34_s11 = sshll.u32 %s68_s0, 4  ;;  %s17_s14 = sshll.u32 %s70_s2, 4  ;;  %s18_s14 = int_to_ptr.hbm [resolvable:$true] %s17_s14 }
   0x2   :  { %s10_s17 = scalar_lea.hbm %s69_s1, %s34_s11  ;;  %s43_s21 = smov 0  }
   0x3   :  { %s15_s18 = sshll.u32 %s10_s17, 4  ;;  %s16_s18 = int_to_ptr.hbm [resolvable:$true] %s15_s18 }
   0x4   :  { %21 = dma.general %s16_s18, 256, %s18_s14, %s41_s19, %s42_s20, [#allocation6], %s43_s21, 0  }
   0x5   :  { %39 = dma.done.wait [#allocation2], 256 }
   0x6   :  { %40 = vsyncadd [#allocation2], 4294967040 }
   0x7   :  { %26 = vsyncmov [#allocation2] }
   0xa   :  { %s27_s22 = vpop.sfrf %26 }
   0xb   :  { %p35_p0 = scmp.ne.s32.totalorder %s27_s22, 0 }
   0xd   :  { %31 = shalt.err (%p35_p0)  }

</bundles_post_ra>
